<compile_context>
chip_gen: v6e
topology: v6e:2x2x1
jax: 0.10.0
libtpu: 0.0.40
codegen_flags: <defaults>
</compile_context>

<pallas_src>
import functools

import jax
import jax.numpy as jnp
from jax import lax
from jax.experimental import pallas as pl
from jax.experimental.pallas import tpu as pltpu

_LANES = 128
_ACC_ROWS = 64                       # accumulator rows: 8 vregs -> 8 independent add chains
_DEFAULT_TILE_ROWS = 4096            # 4096 x 128 f32 = 2 MiB per input block
_MIN_PALLAS_ELEMS = 1 << 20          # below this, dispatch overhead dominates -> plain jnp
_VMEM_LIMIT_BYTES = 48 * 1024 * 1024  # safe on v5e/v6e (128 MiB) and v7x (64 MiB)


def _cdiv(a, b):
    return -(-a // b)


def _round_up(a, b):
    return _cdiv(a, b) * b


@functools.lru_cache(maxsize=None)
def _num_core_shards():
    """2 on dual-TensorCore chips (v4 / v5p / v7x megacore), else 1."""
    try:
        dev = jax.devices()[0]
    except Exception:
        return 1
    if dev.platform != "tpu":
        return 1
    kind = dev.device_kind.lower()
    return 2 if any(tag in kind for tag in ("v4", "v5p", "v7")) else 1


def _sublane_multiple(dtype):
    # Min second-minor block multiple for packed dtypes: f32->8, bf16->16, i8/fp8->32.
    return {1: 32, 2: 16, 4: 8, 8: 8}.get(jnp.dtype(dtype).itemsize, 8)


def _mse_partial_kernel(o_ref, t_ref, out_ref, *, tile_rows, acc_rows, rows,
                        tiles_per_shard):
    """Per-core-shard partial sum of squared differences.

    Grid = (core_shard, row_tile); the inner axis is the reduction and the
    output block (index_map ignores it) is the VMEM-resident accumulator.
    """
    c = pl.program_id(0)
    i = pl.program_id(1)

    @pl.when(i == 0)
    def _():
        out_ref[...] = jnp.zeros_like(out_ref)

    # Logical (unclamped) tile index.  The index_map clamps the DMA'd block, so
    # any shard-padding steps re-read the last block; they are fully masked
    # out below because this logical index places them past `rows`.
    tile_idx = c * tiles_per_shard + i
    row0 = tile_idx * tile_rows

    # In-kernel cast: inputs stream from HBM in their native dtype.
    o = o_ref[...].astype(jnp.float32)
    t = t_ref[...].astype(jnp.float32)
    diff = o - t
    sq = diff * diff

    # Mask rows past the real data.  OOB / duplicated block contents are
    # undefined (possibly NaN), so this must be a select, not a multiply.
    row_idx = row0 + lax.broadcasted_iota(jnp.int32, sq.shape, 0)
    sq = jnp.where(row_idx < rows, sq, 0.0)

    # Fold (tile_rows, 128) -> (acc_rows, 128): layout-preserving sublane
    # split, pure VPU adds, hidden under the HBM-bound DMA stream.
    out_ref[...] += jnp.sum(
        sq.reshape(tile_rows // acc_rows, acc_rows, _LANES), axis=0)


@functools.partial(jax.jit, static_argnames=("tile_rows",))
def mse_loss_pallas(output, target, *, tile_rows=_DEFAULT_TILE_ROWS):
    """MSELoss(reduction='mean') with the reduction done in a Pallas TPU kernel."""
    assert output.shape == target.shape
    total = output.size

    # TODO(synk): for N-D inputs whose trailing dims are not lane-dense this
    # flatten may lower to one relayout copy per input; avoiding it would need
    # shape-specific BlockSpecs over the original layout.
    o = output.reshape(-1)
    t = target.reshape(-1)

    sub = max(_sublane_multiple(output.dtype), _sublane_multiple(target.dtype))
    quantum = sub * _LANES
    padded_total = _round_up(total, quantum)
    if padded_total != total:
        # Rare path (total not a multiple of sub*128): identical zero padding
        # on both arrays keeps the sum exact (diff == 0 on the pad region).
        o = jnp.pad(o, (0, padded_total - total))
        t = jnp.pad(t, (0, padded_total - total))
    rows = padded_total // _LANES          # multiple of `sub`, >= sub

    o2 = o.reshape(rows, _LANES)
    t2 = t.reshape(rows, _LANES)

    # Tile selection: big blocks to amortize per-grid-step overhead, clamped so
    # the block never exceeds the array and stays a multiple of the dtype's
    # sublane quantum / the accumulator fold width.
    if rows >= _ACC_ROWS:
        tr = min(tile_rows, rows)
        tr -= tr % _ACC_ROWS
        acc_rows = _ACC_ROWS
    else:
        tr = rows
        acc_rows = rows

    total_tiles = _cdiv(rows, tr)
    shards = max(1, min(_num_core_shards(), total_tiles))
    tiles_per_shard = _cdiv(total_tiles, shards)

    kernel = functools.partial(
        _mse_partial_kernel, tile_rows=tr, acc_rows=acc_rows, rows=rows,
        tiles_per_shard=tiles_per_shard)

    def in_index(c, i):
        # Clamp so shard-padding steps never DMA out of range; the kernel masks
        # their contribution to zero via the unclamped logical index.
        return (jnp.minimum(c * tiles_per_shard + i, total_tiles - 1), 0)

    bytes_accessed = (total * o2.dtype.itemsize + total * t2.dtype.itemsize
                      + shards * acc_rows * _LANES * 4)

    partials = pl.pallas_call(
        kernel,
        out_shape=jax.ShapeDtypeStruct((shards * acc_rows, _LANES), jnp.float32),
        grid_spec=pltpu.PrefetchScalarGridSpec(
            num_scalar_prefetch=0,
            grid=(shards, tiles_per_shard),
            in_specs=[
                pl.BlockSpec((tr, _LANES), in_index),
                pl.BlockSpec((tr, _LANES), in_index),
            ],
            out_specs=pl.BlockSpec((acc_rows, _LANES), lambda c, i: (c, 0)),
        ),
        compiler_params=pltpu.CompilerParams(
            # TODO(synk): verify on a v7x xprof trace that the size-2 parallel
            # axis lands one shard on each TensorCore; if not, switch it to
            # pltpu.CORE_PARALLEL.
            dimension_semantics=("parallel", "arbitrary"),
            vmem_limit_bytes=_VMEM_LIMIT_BYTES,
        ),
        cost_estimate=pl.CostEstimate(
            flops=3 * total, transcendentals=0, bytes_accessed=bytes_accessed),
    )(o2, t2)

    # Final cross-lane reduce + mean: runs exactly once, outside the hot loop.
    return jnp.sum(partials) / jnp.float32(total)


@jax.jit
def _mse_loss_small(output, target):
    o = output.astype(jnp.float32)
    t = target.astype(jnp.float32)
    return jnp.mean((o - t) ** 2)


class MSELossPallas:
    """Stand-in for torch.nn.MSELoss(reduction='mean').

    Large inputs run the Pallas reduction kernel; small inputs (where
    pallas_call dispatch overhead dwarfs the data movement) use a fused jnp
    fast path.
    """

    def __init__(self, min_pallas_elems=_MIN_PALLAS_ELEMS,
                 tile_rows=_DEFAULT_TILE_ROWS):
        self.min_pallas_elems = min_pallas_elems
        self.tile_rows = tile_rows

    def __call__(self, output, target):
        if output.size < self.min_pallas_elems:
            return _mse_loss_small(output, target)
        return mse_loss_pallas(output, target, tile_rows=self.tile_rows)


class Metric:
    """JAX port of the PyTorch Metric wrapper (model = MSELoss)."""

    def __init__(self, model, **kwargs):
        self.model = model(**kwargs)
        self.S = 0.0
        self.n = 0

    def reset(self):
        self.S = 0.0
        self.n = 0

    def __call__(self, output, target):
        y = self.model(output, target)
        self.S += y
        self.n += 1
        return y

    def get(self):
        return self.S / self.n


if __name__ == "__main__":
    key = jax.random.PRNGKey(0)
    k1, k2, k3, k4, k5, k6, k7, k8 = jax.random.split(key, 8)

    # Small NCHW-like shape: batch=2, channels=4, spatial=16x16 -> 2048 elems.
    x_shape = (2, 4, 16, 16)
    output = jax.random.normal(k1, x_shape, dtype=jnp.float32)
    target = jax.random.normal(k2, x_shape, dtype=jnp.float32)

    # Force the Pallas path even at this small demo shape.
    metric = Metric(MSELossPallas, min_pallas_elems=0)
    y = jax.block_until_ready(metric(output, target))
    ref = jnp.mean((output - target) ** 2)
    assert jnp.allclose(y, ref, rtol=1e-5, atol=1e-6), (y, ref)

    running = jax.block_until_ready(metric.get())
    assert jnp.allclose(running, ref, rtol=1e-5, atol=1e-6), (running, ref)

    # Ragged-tail path: element count not a multiple of 128 (tiny wrapper pad).
    odd_shape = (2, 3, 5, 7)
    o_odd = jax.random.normal(k3, odd_shape, dtype=jnp.float32)
    t_odd = jax.random.normal(k4, odd_shape, dtype=jnp.float32)
    y_odd = jax.block_until_ready(mse_loss_pallas(o_odd, t_odd))
    ref_odd = jnp.mean((o_odd - t_odd) ** 2)
    assert jnp.allclose(y_odd, ref_odd, rtol=1e-5, atol=1e-6), (y_odd, ref_odd)

    # Multi-tile path with a partial last block (rows not a multiple of the
    # tile): exercises the in-kernel row masking and the shard-index clamp.
    big_shape = (300, 1024)
    o_big = jax.random.normal(k5, big_shape, dtype=jnp.float32)
    t_big = jax.random.normal(k6, big_shape, dtype=jnp.float32)
    y_big = jax.block_until_ready(mse_loss_pallas(o_big, t_big, tile_rows=128))
    ref_big = jnp.mean((o_big - t_big) ** 2)
    assert jnp.allclose(y_big, ref_big, rtol=1e-5, atol=1e-6), (y_big, ref_big)

    # bf16 inputs: the dtype cast happens inside the kernel (native-dtype DMA).
    bf_shape = (4, 8, 32, 32)
    o_bf = jax.random.normal(k7, bf_shape, dtype=jnp.float32).astype(jnp.bfloat16)
    t_bf = jax.random.normal(k8, bf_shape, dtype=jnp.float32).astype(jnp.bfloat16)
    y_bf = jax.block_until_ready(mse_loss_pallas(o_bf, t_bf))
    ref_bf = jnp.mean((o_bf.astype(jnp.float32) - t_bf.astype(jnp.float32)) ** 2)
    assert jnp.allclose(y_bf, ref_bf, rtol=1e-4, atol=1e-5), (y_bf, ref_bf)

    print("KERNEL_OK")
</pallas_src>

<mosaic_0001>
module attributes {stable_mosaic.version = 11 : i64} {
  func.func @_mse_partial_kernel(%arg0: i32, %arg1: i32, %arg2: memref<16x128xf32, #tpu.memory_space<vmem>>, %arg3: memref<16x128xf32, #tpu.memory_space<vmem>>, %arg4: memref<16x128xf32, #tpu.memory_space<vmem>>) attributes {dimension_semantics = [#tpu.dimension_semantics<parallel>, #tpu.dimension_semantics<arbitrary>], iteration_bounds = array<i64: 1, 1>, scalar_prefetch = 0 : i64, scratch_operands = 0 : i64, tpu.core_type = #tpu.core_type<tc>, window_params = [{transform_indices = @transform_0, window_bounds = array<i64: 16, 128>}, {transform_indices = @transform_1, window_bounds = array<i64: 16, 128>}, {transform_indices = @transform_2, window_bounds = array<i64: 16, 128>}]} {
    %c0_i32 = arith.constant 0 : i32
    %0 = arith.cmpi eq, %arg1, %c0_i32 : i32
    %1 = arith.extui %0 : i1 to i32
    %c0_i32_0 = arith.constant 0 : i32
    %2 = arith.cmpi ne, %1, %c0_i32_0 : i32
    scf.if %2 {
      %cst_10 = arith.constant 0.000000e+00 : f32
      %22 = vector.broadcast %cst_10 : f32 to vector<16x128xf32>
      %c0_11 = arith.constant 0 : index
      %c0_12 = arith.constant 0 : index
      %23 = vector.load %arg4[%c0_11, %c0_12] : memref<16x128xf32, #tpu.memory_space<vmem>>, vector<16x128xf32>
      tpu.vector_store %arg4[%c0_11, %c0_12], %22 {strides = array<i32>} : memref<16x128xf32, #tpu.memory_space<vmem>>, vector<16x128xf32>,
    } else {
    }
    %c1_i32 = arith.constant 1 : i32
    %3 = arith.muli %arg0, %c1_i32 : i32
    %4 = arith.addi %3, %arg1 : i32
    %c16_i32 = arith.constant 16 : i32
    %5 = arith.muli %4, %c16_i32 : i32
    %c0 = arith.constant 0 : index
    %c0_1 = arith.constant 0 : index
    %6 = vector.load %arg2[%c0, %c0_1] : memref<16x128xf32, #tpu.memory_space<vmem>>, vector<16x128xf32>
    %c0_2 = arith.constant 0 : index
    %c0_3 = arith.constant 0 : index
    %7 = vector.load %arg3[%c0_2, %c0_3] : memref<16x128xf32, #tpu.memory_space<vmem>>, vector<16x128xf32>
    %8 = arith.subf %6, %7 : vector<16x128xf32>
    %9 = arith.mulf %8, %8 : vector<16x128xf32>
    %10 = tpu.iota {dimensions = array<i32: 0>} : vector<16x128xi32>
    %11 = vector.broadcast %5 : i32 to vector<16x128xi32>
    %12 = arith.addi %11, %10 : vector<16x128xi32>
    %c16_i32_4 = arith.constant 16 : i32
    %13 = vector.broadcast %c16_i32_4 : i32 to vector<16x128xi32>
    %14 = arith.cmpi slt, %12, %13 : vector<16x128xi32>
    %cst = arith.constant 0.000000e+00 : f32
    %15 = vector.broadcast %cst : f32 to vector<16x128xf32>
    %16 = arith.select %14, %9, %15 : vector<16x128xi1>, vector<16x128xf32>
    %c0_5 = arith.constant 0 : index
    %c0_6 = arith.constant 0 : index
    %17 = vector.load %arg4[%c0_5, %c0_6] : memref<16x128xf32, #tpu.memory_space<vmem>>, vector<16x128xf32>
    %18 = vector.shape_cast %16 : vector<16x128xf32> to vector<1x16x128xf32>
    %cst_7 = arith.constant dense<0.000000e+00> : vector<16x128xf32>
    %19 = vector.multi_reduction <add>, %18, %cst_7 [0] : vector<1x16x128xf32> to vector<16x128xf32>
    %20 = arith.addf %17, %19 : vector<16x128xf32>
    %c0_8 = arith.constant 0 : index
    %c0_9 = arith.constant 0 : index
    %21 = vector.load %arg4[%c0_8, %c0_9] : memref<16x128xf32, #tpu.memory_space<vmem>>, vector<16x128xf32>
    tpu.vector_store %arg4[%c0_8, %c0_9], %20 {strides = array<i32>} : memref<16x128xf32, #tpu.memory_space<vmem>>, vector<16x128xf32>,
    return
  }
  func.func @transform_0(%arg0: i32, %arg1: i32) -> (i32, i32) {
    %c1_i32 = arith.constant 1 : i32
    %0 = arith.muli %arg0, %c1_i32 : i32
    %1 = arith.addi %0, %arg1 : i32
    %c0_i32 = arith.constant 0 : i32
    %2 = arith.minsi %1, %c0_i32 : i32
    %c0_i32_0 = arith.constant 0 : i32
    %c0_i32_1 = arith.constant 0 : i32
    return %2, %c0_i32_0 : i32, i32
  }
  func.func @transform_1(%arg0: i32, %arg1: i32) -> (i32, i32) {
    %c1_i32 = arith.constant 1 : i32
    %0 = arith.muli %arg0, %c1_i32 : i32
    %1 = arith.addi %0, %arg1 : i32
    %c0_i32 = arith.constant 0 : i32
    %2 = arith.minsi %1, %c0_i32 : i32
    %c0_i32_0 = arith.constant 0 : i32
    %c0_i32_1 = arith.constant 0 : i32
    return %2, %c0_i32_0 : i32, i32
  }
  func.func @transform_2(%arg0: i32, %arg1: i32) -> (i32, i32) {
    %c0_i32 = arith.constant 0 : i32
    %c0_i32_0 = arith.constant 0 : i32
    return %arg0, %c0_i32 : i32, i32
  }
}

</mosaic_0001>

<bundles_post_ra>
// kernel: mse_loss_pallas.1
= control target key start
LH: loop header
LB: loop body
LE: loop exit
PB: predicated region body
PF: predicated region fallthrough
CT: control target
= control target key end

     0   :  { %s159_s0 = inlined_call_operand.vmem [shape: f32[16,128], index: 0, kind: input, shape index: {}]   ;;  %s160_s1 = inlined_call_operand.vmem [shape: f32[16,128], index: 1, kind: input, shape index: {}]   ;;  %s161_s2 = inlined_call_operand.vmem [shape: f32[16,128], index: 2, kind: output, shape index: {}]  }
   0x1   :  { %v83_v0 = vld [vmem:[%s159_s0] sm:$0xff]  ;;  %v84_v2 = vld [vmem:[%s159_s0 + $0x8] sm:$0xff] }
   0x2   :  { %v85_v1 = vld [vmem:[%s160_s1] sm:$0xff]  ;;  %v86_v4 = vld [vmem:[%s160_s1 + $0x8] sm:$0xff] }
   0x3   :  { %v87_v3 = vsub.f32 %v83_v0, %v85_v1  ;;  %v88_v5 = vsub.f32 %v84_v2, %v86_v4 }
   0x5   :  { %v89_v6 = vmul.f32 %v87_v3, %v87_v3  ;;  %v90_v7 = vmul.f32 %v88_v5, %v88_v5 }
   0x7   :  { %107 = vst [vmem:[%s161_s2] sm:$0xff] %v89_v6  ;;  %108 = vst [vmem:[%s161_s2 + $0x8] sm:$0xff] %v90_v7 }

</bundles_post_ra>
